<compile_context>
chip_gen: v5e
topology: v5e:2x2
jax: 0.10.0
libtpu: 0.0.40
codegen_flags: <defaults>
</compile_context>

<pallas_src>
import functools

import jax
import jax.numpy as jnp
from jax.experimental import pallas as pl
from jax.experimental.pallas import tpu as pltpu


def _round_up(x, m):
    return -(-x // m) * m


# ----------------------------------------------------------------------------
# Tiled GEMM + fused bias (+ LeakyReLU) epilogue  (conv-as-GEMM hot path)
# ----------------------------------------------------------------------------
def _gemm_bias_act_multik_kernel(a_ref, b_ref, bias_ref, o_ref, acc_ref, *,
                                 fuse_lrelu):
    k = pl.program_id(2)

    @pl.when(k == 0)
    def _():
        acc_ref[...] = jnp.zeros_like(acc_ref)

    acc_ref[...] += jnp.dot(a_ref[...], b_ref[...],
                            preferred_element_type=jnp.float32)

    @pl.when(k == pl.num_programs(2) - 1)
    def _():
        y = acc_ref[...] + bias_ref[...]
        if fuse_lrelu:
            y = jnp.where(y > 0, y, 0.2 * y)
        o_ref[...] = y.astype(o_ref.dtype)


def _gemm_bias_act_single_kernel(a_ref, b_ref, bias_ref, o_ref, *, fuse_lrelu):
    y = jnp.dot(a_ref[...], b_ref[...],
                preferred_element_type=jnp.float32) + bias_ref[...]
    if fuse_lrelu:
        y = jnp.where(y > 0, y, 0.2 * y)
    o_ref[...] = y.astype(o_ref.dtype)


def matmul_bias_act(a, b, bias, fuse_lrelu=False):
    """a: (M,K), b: (K,N), bias: (N,). bf16 MXU operands, f32 accumulate. -> (M,N) f32."""
    M, K = a.shape
    _, N = b.shape

    TM = min(512, _round_up(M, 128))
    TK = 512 if K > 512 else _round_up(K, 128)
    Np = _round_up(N, 128)
    TN = 256 if Np % 256 == 0 else Np          # Np here is 128 or a 256-multiple
    Mp = _round_up(M, TM)
    Kp = _round_up(K, TK)

    a_p = a.astype(jnp.bfloat16)
    b_p = b.astype(jnp.bfloat16)
    if (Mp, Kp) != (M, K):
        a_p = jnp.pad(a_p, ((0, Mp - M), (0, Kp - K)))
    if (Kp, Np) != (K, N):
        b_p = jnp.pad(b_p, ((0, Kp - K), (0, Np - N)))
    bias_p = bias.astype(jnp.float32).reshape(1, N)
    if Np != N:
        bias_p = jnp.pad(bias_p, ((0, 0), (0, Np - N)))

    gm, gn, gk = Mp // TM, Np // TN, Kp // TK

    if gk == 1:
        out = pl.pallas_call(
            functools.partial(_gemm_bias_act_single_kernel,
                              fuse_lrelu=fuse_lrelu),
            out_shape=jax.ShapeDtypeStruct((Mp, Np), jnp.float32),
            grid=(gm, gn),
            in_specs=[
                pl.BlockSpec((TM, Kp), lambda i, j: (i, 0)),
                pl.BlockSpec((Kp, TN), lambda i, j: (0, j)),
                pl.BlockSpec((1, TN), lambda i, j: (0, j)),
            ],
            out_specs=pl.BlockSpec((TM, TN), lambda i, j: (i, j)),
            compiler_params=pltpu.CompilerParams(
                dimension_semantics=("parallel", "parallel")),
        )(a_p, b_p, bias_p)
    else:
        out = pl.pallas_call(
            functools.partial(_gemm_bias_act_multik_kernel,
                              fuse_lrelu=fuse_lrelu),
            out_shape=jax.ShapeDtypeStruct((Mp, Np), jnp.float32),
            grid=(gm, gn, gk),
            in_specs=[
                pl.BlockSpec((TM, TK), lambda i, j, k: (i, k)),
                pl.BlockSpec((TK, TN), lambda i, j, k: (k, j)),
                pl.BlockSpec((1, TN), lambda i, j, k: (0, j)),
            ],
            out_specs=pl.BlockSpec((TM, TN), lambda i, j, k: (i, j)),
            scratch_shapes=[pltpu.VMEM((TM, TN), jnp.float32)],
            compiler_params=pltpu.CompilerParams(
                dimension_semantics=("parallel", "parallel", "arbitrary")),
        )(a_p, b_p, bias_p)
    return out[:M, :N]


# ----------------------------------------------------------------------------
# GEMV kernel for the 1-output-channel final conv (avoid padding N 1 -> 128)
# ----------------------------------------------------------------------------
def _gemv_bias_kernel(a_ref, w_ref, bias_ref, o_ref, acc_ref):
    k = pl.program_id(1)

    @pl.when(k == 0)
    def _():
        acc_ref[...] = jnp.zeros_like(acc_ref)

    # Pure VPU multiply-accumulate; per-lane partial sums stay in the scratch.
    acc_ref[...] += a_ref[...].astype(jnp.float32) * w_ref[...].astype(jnp.float32)

    @pl.when(k == pl.num_programs(1) - 1)
    def _():
        o_ref[...] = (jnp.sum(acc_ref[...], axis=1, keepdims=True)
                      + bias_ref[...]).astype(o_ref.dtype)


def matvec_bias(a, w, bias):
    """a: (M,K), w: (K,1) or (K,), bias: (1,) -> (M,1) f32."""
    M, K = a.shape
    w_row = w.reshape(1, K).astype(jnp.bfloat16)

    TM = min(256, _round_up(M, 128))
    TK = 512 if K > 512 else _round_up(K, 128)
    Mp = _round_up(M, TM)
    Kp = _round_up(K, TK)

    a_p = a.astype(jnp.bfloat16)
    if (Mp, Kp) != (M, K):
        a_p = jnp.pad(a_p, ((0, Mp - M), (0, Kp - K)))
    if Kp != K:
        w_row = jnp.pad(w_row, ((0, 0), (0, Kp - K)))
    bias_arr = bias.astype(jnp.float32).reshape(1, 1)

    out = pl.pallas_call(
        _gemv_bias_kernel,
        out_shape=jax.ShapeDtypeStruct((Mp, 1), jnp.float32),
        grid=(Mp // TM, Kp // TK),
        in_specs=[
            pl.BlockSpec((TM, TK), lambda i, k: (i, k)),
            pl.BlockSpec((1, TK), lambda i, k: (0, k)),
            pl.BlockSpec((1, 1), lambda i, k: (0, 0)),
        ],
        out_specs=pl.BlockSpec((TM, 1), lambda i, k: (i, 0)),
        scratch_shapes=[pltpu.VMEM((TM, TK), jnp.float32)],
        compiler_params=pltpu.CompilerParams(
            dimension_semantics=("parallel", "arbitrary")),
    )(a_p, w_row, bias_arr)
    return out[:M, :]


# ----------------------------------------------------------------------------
# Pallas reductions (global sum / L1) with a vector accumulator scratch
# ----------------------------------------------------------------------------
_LANES = 128
_MAX_RED_ROWS = 512


def _sum_abs_diff_kernel(x_ref, y_ref, o_ref, acc_ref):
    i = pl.program_id(0)

    @pl.when(i == 0)
    def _():
        acc_ref[...] = jnp.zeros_like(acc_ref)

    acc_ref[...] += jnp.abs(x_ref[...].astype(jnp.float32)
                            - y_ref[...].astype(jnp.float32))

    @pl.when(i == pl.num_programs(0) - 1)
    def _():
        o_ref[...] = jnp.sum(acc_ref[...], keepdims=True)


def _sum_kernel(x_ref, o_ref, acc_ref):
    i = pl.program_id(0)

    @pl.when(i == 0)
    def _():
        acc_ref[...] = jnp.zeros_like(acc_ref)

    acc_ref[...] += x_ref[...].astype(jnp.float32)

    @pl.when(i == pl.num_programs(0) - 1)
    def _():
        o_ref[...] = jnp.sum(acc_ref[...], keepdims=True)


def _reduce_layout(n):
    total_rows = n // _LANES
    block_rows = min(_MAX_RED_ROWS, (total_rows // 8) * 8)
    if block_rows == 0:
        return 0, 0
    return block_rows, total_rows // block_rows


def pallas_sum_abs_diff(x, y):
    xf = x.reshape(-1)
    yf = y.reshape(-1)
    n = xf.shape[0]
    block_rows, n_blocks = _reduce_layout(n)
    if n_blocks == 0:
        return jnp.sum(jnp.abs(xf.astype(jnp.float32) - yf.astype(jnp.float32)))
    n_main = n_blocks * block_rows * _LANES
    xm = xf[:n_main].reshape(-1, _LANES)
    ym = yf[:n_main].reshape(-1, _LANES)
    main = pl.pallas_call(
        _sum_abs_diff_kernel,
        out_shape=jax.ShapeDtypeStruct((1, 1), jnp.float32),
        grid=(n_blocks,),
        in_specs=[
            pl.BlockSpec((block_rows, _LANES), lambda i: (i, 0)),
            pl.BlockSpec((block_rows, _LANES), lambda i: (i, 0)),
        ],
        out_specs=pl.BlockSpec((1, 1), lambda i: (0, 0)),
        scratch_shapes=[pltpu.VMEM((block_rows, _LANES), jnp.float32)],
        compiler_params=pltpu.CompilerParams(
            dimension_semantics=("arbitrary",)),
    )(xm, ym)[0, 0]
    if n_main < n:
        main = main + jnp.sum(jnp.abs(xf[n_main:].astype(jnp.float32)
                                      - yf[n_main:].astype(jnp.float32)))
    return main


def pallas_sum(x):
    xf = x.reshape(-1)
    n = xf.shape[0]
    block_rows, n_blocks = _reduce_layout(n)
    if n_blocks == 0:
        return jnp.sum(xf.astype(jnp.float32))
    n_main = n_blocks * block_rows * _LANES
    xm = xf[:n_main].reshape(-1, _LANES)
    main = pl.pallas_call(
        _sum_kernel,
        out_shape=jax.ShapeDtypeStruct((1, 1), jnp.float32),
        grid=(n_blocks,),
        in_specs=[pl.BlockSpec((block_rows, _LANES), lambda i: (i, 0))],
        out_specs=pl.BlockSpec((1, 1), lambda i: (0, 0)),
        scratch_shapes=[pltpu.VMEM((block_rows, _LANES), jnp.float32)],
        compiler_params=pltpu.CompilerParams(
            dimension_semantics=("arbitrary",)),
    )(xm)[0, 0]
    if n_main < n:
        main = main + jnp.sum(xf[n_main:].astype(jnp.float32))
    return main


def pallas_mean_abs_diff(x, y):
    return pallas_sum_abs_diff(x, y) / x.size


def pallas_mean(x):
    return pallas_sum(x) / x.size


# ----------------------------------------------------------------------------
# Channels-last patch extraction (kernel=4, padding=2, stride in {1,2})
# ----------------------------------------------------------------------------
# TODO(synk): a fully-fused direct-conv Pallas kernel would avoid materializing
# the patch matrix (16x/64x the activation); kept as bf16 im2col for robustness.
def extract_patches_2d(x, stride):
    B, H, W, C = x.shape
    pad, k = 2, 4
    xp = jnp.pad(x, ((0, 0), (pad, pad), (pad, pad), (0, 0)))
    Ho = (H + 2 * pad - k) // stride + 1
    Wo = (W + 2 * pad - k) // stride + 1
    cols = []
    for i in range(k):
        for j in range(k):
            cols.append(xp[:, i:i + stride * (Ho - 1) + 1:stride,
                              j:j + stride * (Wo - 1) + 1:stride, :])
    patches = jnp.concatenate(cols, axis=-1)        # (B,Ho,Wo,16*C) tap-major
    return patches.reshape(B * Ho * Wo, k * k * C), (B, Ho, Wo)


def extract_patches_3d(x, stride):
    B, D, H, W, C = x.shape
    pad, k = 2, 4
    xp = jnp.pad(x, ((0, 0), (pad, pad), (pad, pad), (pad, pad), (0, 0)))
    Do = (D + 2 * pad - k) // stride + 1
    Ho = (H + 2 * pad - k) // stride + 1
    Wo = (W + 2 * pad - k) // stride + 1
    cols = []
    for di in range(k):
        for i in range(k):
            for j in range(k):
                cols.append(xp[:, di:di + stride * (Do - 1) + 1:stride,
                                  i:i + stride * (Ho - 1) + 1:stride,
                                  j:j + stride * (Wo - 1) + 1:stride, :])
    patches = jnp.concatenate(cols, axis=-1)        # (B,Do,Ho,Wo,64*C)
    return patches.reshape(B * Do * Ho * Wo, k ** 3 * C), (B, Do, Ho, Wo)


# ----------------------------------------------------------------------------
# PatchGAN discriminators (NLayerDiscriminator / NLayerDiscriminator3D)
# ----------------------------------------------------------------------------
def batchnorm(y, gamma, beta, eps=1e-5):
    # y: (M, C) channels-last; train-mode batch statistics per channel.
    # TODO(synk): per-device batch stats only; SyncBatchNorm cross-replica sync
    # is not replicated here.
    mean = jnp.mean(y, axis=0, keepdims=True)
    var = jnp.mean(jnp.square(y - mean), axis=0, keepdims=True)
    return (y - mean) * (gamma / jnp.sqrt(var + eps)) + beta


def leaky_relu(x, slope=0.2):
    return jnp.where(x > 0, x, slope * x)


def init_disc_params(key, input_nc=3, ndf=64, n_layers=3, ndims=2):
    kw = 4
    chans = [input_nc, ndf]
    nf = ndf
    for _ in range(1, n_layers):
        nf = min(nf * 2, 512)
        chans.append(nf)
    nf = min(nf * 2, 512)
    chans.append(nf)
    chans.append(1)
    strides = [2] * n_layers + [1, 1]
    has_bn = [False] + [True] * n_layers + [False]
    has_act = [True] * (n_layers + 1) + [False]

    params = []
    for i in range(len(chans) - 1):
        key, kwk, kgk = jax.random.split(key, 3)
        cin, cout = chans[i], chans[i + 1]
        # weights_init: N(0, 0.02), PyTorch layout (Cout, Cin, k, ...)
        w = 0.02 * jax.random.normal(kwk, (cout, cin) + (kw,) * ndims,
                                     jnp.float32)
        # Reorder to match channels-last patch feature order (taps slow, Cin fast).
        if ndims == 2:
            w_mat = w.transpose(2, 3, 1, 0).reshape(kw * kw * cin, cout)
        else:
            w_mat = w.transpose(2, 3, 4, 1, 0).reshape(kw ** 3 * cin, cout)
        p = {
            "w_mat": w_mat.astype(jnp.bfloat16),
            "b": jnp.zeros((cout,), jnp.float32),
            "stride": strides[i],
            "bn": has_bn[i],
            "act": has_act[i],
        }
        if has_bn[i]:
            p["gamma"] = 1.0 + 0.02 * jax.random.normal(kgk, (cout,), jnp.float32)
            p["beta"] = jnp.zeros((cout,), jnp.float32)
        params.append(p)
    return params


def discriminator_forward(params, x, ndims):
    """x: channels-last (B,H,W,C) or (B,T,H,W,C) f32."""
    feats = []
    h = x
    for p in params:
        if ndims == 2:
            patches, spatial = extract_patches_2d(h.astype(jnp.bfloat16),
                                                  p["stride"])
        else:
            patches, spatial = extract_patches_3d(h.astype(jnp.bfloat16),
                                                  p["stride"])
        cout = p["w_mat"].shape[1]
        if cout == 1:
            y = matvec_bias(patches, p["w_mat"], p["b"])
        else:
            fuse = p["act"] and not p["bn"]
            y = matmul_bias_act(patches, p["w_mat"], p["b"], fuse_lrelu=fuse)
            if p["bn"]:
                y = batchnorm(y, p["gamma"], p["beta"])
                if p["act"]:
                    y = leaky_relu(y)
        h = y.reshape(spatial + (cout,))
        feats.append(h)
    return feats[-1], feats


# ----------------------------------------------------------------------------
# LPIPSWithDiscriminator forward
# ----------------------------------------------------------------------------
def adopt_weight(global_step, threshold=0, value=0.0):
    return jnp.where(jnp.asarray(global_step) < threshold,
                     jnp.float32(value), jnp.float32(1.0))


def hinge_d_loss(logits_real, logits_fake):
    loss_real = pallas_mean(jax.nn.relu(1.0 - logits_real))
    loss_fake = pallas_mean(jax.nn.relu(1.0 + logits_fake))
    return 0.5 * (loss_real + loss_fake)


def lpips_with_discriminator_forward(
        params2d, params3d, codebook_loss, inputs, reconstructions,
        optimizer_idx, global_step, rng,
        pixel_weight=4.0, gan_weight=1.0, perceptual_weight=4.0,
        gan_feat_weight=4.0, disc_start=0, timesteps=8):
    b, c, t, h, w = inputs.shape

    # rec_loss = pixel_weight * F.l1_loss(inputs, reconstructions)
    rec_loss = pixel_weight * pallas_mean_abs_diff(inputs, reconstructions)

    # Channels-last once; all discriminator compute stays channels-last.
    inputs_cl = jnp.transpose(inputs, (0, 2, 3, 4, 1))          # (B,T,H,W,C)
    recon_cl = jnp.transpose(reconstructions, (0, 2, 3, 4, 1))

    # Random frame selection (torch.gather dim=2 equivalent).
    frame_idx = jax.random.randint(rng, (b,), 0, timesteps)
    idx = jnp.broadcast_to(frame_idx.reshape(b, 1, 1, 1, 1), (b, 1, h, w, c))
    inputs_2d = jnp.take_along_axis(inputs_cl, idx, axis=1).squeeze(1)
    recon_2d = jnp.take_along_axis(recon_cl, idx, axis=1).squeeze(1)

    disc_factor = adopt_weight(global_step, threshold=disc_start)

    if optimizer_idx == 0:
        # TODO(synk): LPIPS perceptual net needs pretrained VGG weights (not
        # constructible in-script); p_loss contribution set to 0.0.
        p_loss = jnp.float32(0.0)

        _, pred_real_2d = discriminator_forward(params2d, inputs_2d, 2)
        _, pred_real_3d = discriminator_forward(params3d, inputs_cl, 3)
        logits_fake_2d, pred_fake_2d = discriminator_forward(params2d, recon_2d, 2)
        logits_fake_3d, pred_fake_3d = discriminator_forward(params3d, recon_cl, 3)

        g_loss = -disc_factor * gan_weight * (
            pallas_mean(logits_fake_2d) + pallas_mean(logits_fake_3d))

        image_gan_feat_loss = jnp.float32(0.0)
        video_gan_feat_loss = jnp.float32(0.0)
        for i in range(len(pred_real_2d) - 1):
            image_gan_feat_loss += pallas_mean_abs_diff(
                pred_fake_2d[i], jax.lax.stop_gradient(pred_real_2d[i]))
        for i in range(len(pred_real_3d) - 1):
            video_gan_feat_loss += pallas_mean_abs_diff(
                pred_fake_3d[i], jax.lax.stop_gradient(pred_real_3d[i]))
        gan_feat_loss = disc_factor * gan_feat_weight * (
            image_gan_feat_loss + video_gan_feat_loss)

        # NOTE: the reference forward does not add codebook_loss to the
        # generator loss; the argument is kept for API parity only.
        return rec_loss + p_loss + g_loss + gan_feat_loss

    if optimizer_idx == 1:
        logits_real_2d, _ = discriminator_forward(params2d, inputs_2d, 2)
        logits_real_3d, _ = discriminator_forward(params3d, inputs_cl, 3)
        logits_fake_2d, _ = discriminator_forward(params2d, recon_2d, 2)
        logits_fake_3d, _ = discriminator_forward(params3d, recon_cl, 3)
        d_loss = disc_factor * gan_weight * (
            hinge_d_loss(logits_real_2d, logits_fake_2d) +
            hinge_d_loss(logits_real_3d, logits_fake_3d))
        return d_loss


# ----------------------------------------------------------------------------
if __name__ == "__main__":
    key = jax.random.PRNGKey(0)
    k_in, k_rec, k_d2, k_d3, k_frame = jax.random.split(key, 5)

    b, c, t, h, w = 2, 3, 8, 16, 16   # (B, C, T, H, W), disc_in_channels=3
    inputs = jax.random.normal(k_in, (b, c, t, h, w), jnp.float32)
    reconstructions = jax.random.normal(k_rec, (b, c, t, h, w), jnp.float32)

    params2d = init_disc_params(k_d2, input_nc=c, ndf=64, n_layers=3, ndims=2)
    params3d = init_disc_params(k_d3, input_nc=c, ndf=64, n_layers=3, ndims=3)

    g_loss = lpips_with_discriminator_forward(
        params2d, params3d, codebook_loss=0.0,
        inputs=inputs, reconstructions=reconstructions,
        optimizer_idx=0, global_step=1, rng=k_frame,
        disc_start=0, timesteps=t)

    d_loss = lpips_with_discriminator_forward(
        params2d, params3d, codebook_loss=0.0,
        inputs=inputs, reconstructions=reconstructions,
        optimizer_idx=1, global_step=1, rng=k_frame,
        disc_start=0, timesteps=t)

    jax.block_until_ready((g_loss, d_loss))
    print("KERNEL_OK")
</pallas_src>

<mosaic_0001>
module attributes {stable_mosaic.version = 11 : i64} {
  func.func @_sum_abs_diff_kernel(%arg0: i32, %arg1: memref<96x128xf32, #tpu.memory_space<vmem>>, %arg2: memref<96x128xf32, #tpu.memory_space<vmem>>, %arg3: memref<1x1xf32, #tpu.memory_space<vmem>>, %arg4: memref<96x128xf32, #tpu.memory_space<vmem>>) attributes {dimension_semantics = [#tpu.dimension_semantics<arbitrary>], iteration_bounds = array<i64: 1>, scalar_prefetch = 0 : i64, scratch_operands = 1 : i64, tpu.core_type = #tpu.core_type<tc>, window_params = [{transform_indices = @transform_0, window_bounds = array<i64: 96, 128>}, {transform_indices = @transform_1, window_bounds = array<i64: 96, 128>}, {pipeline_mode = #tpu.pipeline_mode<synchronous>, transform_indices = @transform_2, window_bounds = array<i64: 1, 1>}]} {
    %c0_i32 = arith.constant 0 : i32
    %0 = arith.cmpi eq, %arg0, %c0_i32 : i32
    %1 = arith.extui %0 : i1 to i32
    %c0_i32_0 = arith.constant 0 : i32
    %2 = arith.cmpi ne, %1, %c0_i32_0 : i32
    scf.if %2 {
      %cst = arith.constant 0.000000e+00 : f32
      %13 = vector.broadcast %cst : f32 to vector<96x128xf32>
      %c0_10 = arith.constant 0 : index
      %c0_11 = arith.constant 0 : index
      %14 = vector.load %arg4[%c0_10, %c0_11] : memref<96x128xf32, #tpu.memory_space<vmem>>, vector<96x128xf32>
      tpu.vector_store %arg4[%c0_10, %c0_11], %13 {strides = array<i32>} : memref<96x128xf32, #tpu.memory_space<vmem>>, vector<96x128xf32>,
    } else {
    }
    %c0 = arith.constant 0 : index
    %c0_1 = arith.constant 0 : index
    %3 = vector.load %arg4[%c0, %c0_1] : memref<96x128xf32, #tpu.memory_space<vmem>>, vector<96x128xf32>
    %c0_2 = arith.constant 0 : index
    %c0_3 = arith.constant 0 : index
    %4 = vector.load %arg1[%c0_2, %c0_3] : memref<96x128xf32, #tpu.memory_space<vmem>>, vector<96x128xf32>
    %c0_4 = arith.constant 0 : index
    %c0_5 = arith.constant 0 : index
    %5 = vector.load %arg2[%c0_4, %c0_5] : memref<96x128xf32, #tpu.memory_space<vmem>>, vector<96x128xf32>
    %6 = arith.subf %4, %5 : vector<96x128xf32>
    %7 = math.absf %6 : vector<96x128xf32>
    %8 = arith.addf %3, %7 : vector<96x128xf32>
    %c0_6 = arith.constant 0 : index
    %c0_7 = arith.constant 0 : index
    %9 = vector.load %arg4[%c0_6, %c0_7] : memref<96x128xf32, #tpu.memory_space<vmem>>, vector<96x128xf32>
    tpu.vector_store %arg4[%c0_6, %c0_7], %8 {strides = array<i32>} : memref<96x128xf32, #tpu.memory_space<vmem>>, vector<96x128xf32>,
    %c0_i32_8 = arith.constant 0 : i32
    %10 = arith.cmpi eq, %arg0, %c0_i32_8 : i32
    %11 = arith.extui %10 : i1 to i32
    %c0_i32_9 = arith.constant 0 : i32
    %12 = arith.cmpi ne, %11, %c0_i32_9 : i32
    scf.if %12 {
      %c0_10 = arith.constant 0 : index
      %c0_11 = arith.constant 0 : index
      %13 = vector.load %arg4[%c0_10, %c0_11] : memref<96x128xf32, #tpu.memory_space<vmem>>, vector<96x128xf32>
      %14 = vector.shape_cast %13 : vector<96x128xf32> to vector<1x96x128xf32>
      %cst = arith.constant dense<0.000000e+00> : vector<1xf32>
      %15 = vector.multi_reduction <add>, %14, %cst [1, 2] : vector<1x96x128xf32> to vector<1xf32>
      %16 = vector.shape_cast %15 : vector<1xf32> to vector<1x1x1xf32>
      %17 = vector.extract %16[0, 0, 0] : f32 from vector<1x1x1xf32>
      %18 = vector.broadcast %17 : f32 to vector<1x1xf32>
      %c0_12 = arith.constant 0 : index
      %c0_13 = arith.constant 0 : index
      %19 = vector.load %arg3[%c0_12, %c0_13] : memref<1x1xf32, #tpu.memory_space<vmem>>, vector<1x1xf32>
      tpu.vector_store %arg3[%c0_12, %c0_13], %18 {strides = array<i32>} : memref<1x1xf32, #tpu.memory_space<vmem>>, vector<1x1xf32>,
    } else {
    }
    return
  }
  func.func @transform_0(%arg0: i32) -> (i32, i32) {
    %c0_i32 = arith.constant 0 : i32
    %c0_i32_0 = arith.constant 0 : i32
    return %arg0, %c0_i32 : i32, i32
  }
  func.func @transform_1(%arg0: i32) -> (i32, i32) {
    %c0_i32 = arith.constant 0 : i32
    %c0_i32_0 = arith.constant 0 : i32
    return %arg0, %c0_i32 : i32, i32
  }
  func.func @transform_2(%arg0: i32) -> (i32, i32) {
    %c0_i32 = arith.constant 0 : i32
    %c0_i32_0 = arith.constant 0 : i32
    %c0_i32_1 = arith.constant 0 : i32
    return %c0_i32, %c0_i32_0 : i32, i32
  }
}

</mosaic_0001>

<bundles_post_ra>
// kernel: tpu_custom_call.1
= control target key start
LH: loop header
LB: loop body
LE: loop exit
PB: predicated region body
PF: predicated region fallthrough
CT: control target
= control target key end

     0   :  { %7 = vsyncpa [#allocation4], 0  ;;  %s314_s0 = inlined_call_operand.hbm [shape: f32[96,128], index: 0, kind: input, shape index: {}]   ;;  %s315_s1 = inlined_call_operand.hbm [shape: f32[96,128], index: 1, kind: input, shape index: {}]   ;;  %s316_s2 = inlined_call_operand.hbm [shape: f32[1,1], index: 2, kind: output, shape index: {}]  }
   0x1   :  { %8 = vsyncpa [#allocation7], 0 }
   0x2   :  { %9 = vsyncpa [#allocation5], 0  ;;  %s14_s11 = sshll.u32 %s314_s0, 4  ;;  %s285_s12 = smov [#allocation3]   ;;  %s15_s11 = int_to_ptr.hbm [resolvable:$true] %s14_s11 }
   0x3   :  { %s16_s13 = sshll.u32 %s285_s12, 4  ;;  %s27_s16 = sshll.u32 %s315_s1, 4  ;;  %s17_s13 = int_to_ptr.vmem [resolvable:$true] %s16_s13  ;;  %s28_s16 = int_to_ptr.hbm [resolvable:$true] %s27_s16 }
   0x4   :  { %s286_s17 = smov 128   ;;  %s287_s18 = smov 8  }
   0x5   :  { %22 = dma.hbm_to_vmem [thread:$0]  %s15_s11, 1536, %s17_s13, [#allocation4], %s286_s17, %s286_s17, %s287_s18  }
   0x6   :  { %s288_s19 = smov [#allocation6]  }
   0x7   :  { %s29_s20 = sshll.u32 %s288_s19, 4  ;;  %s30_s20 = int_to_ptr.vmem [resolvable:$true] %s29_s20 }
   0x8   :  { %35 = dma.hbm_to_vmem [thread:$0]  %s28_s16, 1536, %s30_s20, [#allocation7], %s286_s17, %s286_s17, %s287_s18  }
   0x9   :  { %279 = dma.done.wait [#allocation4], 1536  }
   0xa   :  { %280 = vsyncadd [#allocation4], 4294965760 }
   0xb   :  { %281 = dma.done.wait [#allocation7], 1536  }
   0xc   :  { %282 = vsyncadd [#allocation7], 4294965760  ;;  %v72_v0 = vld [vmem:[#allocation3] sm:$0xff]  ;;  %v73_v1 = vld [vmem:[#allocation3 + $0x8] sm:$0xff]  ;;  %s289_s0 = smov [#allocation8]   ;;  %s189_s23 = sshll.u32 %s316_s2, 4  ;;  %s190_s23 = int_to_ptr.hbm [resolvable:$true] %s189_s23 }
   0xd   :  { %v74_v2 = vld [vmem:[#allocation3 + $0x10] sm:$0xff]  ;;  %v75_v3 = vld [vmem:[#allocation3 + $0x18] sm:$0xff]  ;;  %v84_v4 = vld [vmem:[#allocation6] sm:$0xff]  ;;  %s187_s1 = sshll.u32 %s289_s0, 4  ;;  %vm180_vm0 = vcmask 0   ;;  %s188_s1 = int_to_ptr.vmem [resolvable:$true] %s187_s1 }
   0xe   :  { %v85_v5 = vld [vmem:[#allocation6 + $0x8] sm:$0xff]  ;;  %v86_v6 = vld [vmem:[#allocation6 + $0x10] sm:$0xff]  ;;  %v76_v7 = vld [vmem:[#allocation3 + $0x20] sm:$0xff]  ;;  %v96_v10 = vsub.f32 %v72_v0, %v84_v4 }
   0xf   :  { %v87_v8 = vld [vmem:[#allocation6 + $0x18] sm:$0xff]  ;;  %v88_v9 = vld [vmem:[#allocation6 + $0x20] sm:$0xff]  ;;  %v97_v11 = vsub.f32 %v73_v1, %v85_v5  ;;  %v98_v12 = vsub.f32 %v74_v2, %v86_v6  ;;  %v77_v14 = vld [vmem:[#allocation3 + $0x28] sm:$0xff] }
  0x10   :  { %v99_v13 = vsub.f32 %v75_v3, %v87_v8  ;;  %v89_v15 = vld [vmem:[#allocation6 + $0x28] sm:$0xff]  ;;  %v108_v16 = vand.u32 2147483647, %v96_v10  ;;  %v100_v17 = vsub.f32 %v76_v7, %v88_v9  ;;  %v78_v19 = vld [vmem:[#allocation3 + $0x30] sm:$0xff]  ;;  %v79_v25 = vld [vmem:[#allocation3 + $0x38] sm:$0xff] }
  0x11   :  { %v109_v18 = vand.u32 2147483647, %v97_v11  ;;  %v90_v20 = vld [vmem:[#allocation6 + $0x30] sm:$0xff]  ;;  %v110_v21 = vand.u32 2147483647, %v98_v12  ;;  %v101_v22 = vsub.f32 %v77_v14, %v89_v15  ;;  %v91_v26 = vld [vmem:[#allocation6 + $0x38] sm:$0xff] }
  0x12   :  { %v111_v23 = vand.u32 2147483647, %v99_v13  ;;  %v102_v27 = vsub.f32 %v78_v19, %v90_v20  ;;  %v112_v28 = vand.u32 2147483647, %v100_v17  ;;  %v80_v30 = vld [vmem:[#allocation3 + $0x40] sm:$0xff]  ;;  %v103_v32 = vsub.f32 %v79_v25, %v91_v26  ;;  %v81_v35 = vld [vmem:[#allocation3 + $0x48] sm:$0xff] }
  0x13   :  { %v159_v24 = vadd.f32 %v109_v18, %v108_v16  ;;  %v92_v31 = vld [vmem:[#allocation6 + $0x40] sm:$0xff]  ;;  %v113_v33 = vand.u32 2147483647, %v101_v22  ;;  %v93_v36 = vld [vmem:[#allocation6 + $0x48] sm:$0xff]  ;;  %v82_v40 = vld [vmem:[#allocation3 + $0x50] sm:$0xff] }
  0x14   :  { %v104_v37 = vsub.f32 %v80_v30, %v92_v31  ;;  %v114_v38 = vand.u32 2147483647, %v102_v27  ;;  %v94_v41 = vld [vmem:[#allocation6 + $0x50] sm:$0xff]  ;;  %v105_v42 = vsub.f32 %v81_v35, %v93_v36  ;;  %v115_v43 = vand.u32 2147483647, %v103_v32  ;;  %v83_v45 = vld [vmem:[#allocation3 + $0x58] sm:$0xff] }
  0x15   :  { %v160_v29 = vadd.f32 %v159_v24, %v110_v21  ;;  %v95_v46 = vld [vmem:[#allocation6 + $0x58] sm:$0xff]  ;;  %v106_v47 = vsub.f32 %v82_v40, %v94_v41 }
  0x16   :  { %v116_v48 = vand.u32 2147483647, %v104_v37  ;;  %v107_v50 = vsub.f32 %v83_v45, %v95_v46  ;;  %v117_v51 = vand.u32 2147483647, %v105_v42 }
  0x17   :  { %v161_v34 = vadd.f32 %v160_v29, %v111_v23  ;;  %v118_v53 = vand.u32 2147483647, %v106_v47 }
  0x18   :  { %v119_v55 = vand.u32 2147483647, %v107_v50 }
  0x19   :  { %v162_v39 = vadd.f32 %v161_v34, %v112_v28 }
  0x1b   :  { %v163_v44 = vadd.f32 %v162_v39, %v113_v33 }
  0x1d   :  { %v164_v49 = vadd.f32 %v163_v44, %v114_v38 }
  0x1f   :  { %v165_v52 = vadd.f32 %v164_v49, %v115_v43 }
  0x21   :  { %v166_v54 = vadd.f32 %v165_v52, %v116_v48 }
  0x23   :  { %v167_v56 = vadd.f32 %v166_v54, %v117_v51 }
  0x25   :  { %v168_v57 = vadd.f32 %v167_v56, %v118_v53 }
  0x27   :  { %v169_v58 = vadd.f32 %v168_v57, %v119_v55 }
  0x29   :  { %170 = vadd.xlane.f32.xlu0 %v169_v58 }
  0x9c   :  { %v171_v59 = vpop.xlane.xlu0 %170 }
  0x9d   :  { %v172_v60 = vrot.slane %v171_v59, 4 }
  0x9f   :  { %v173_v61 = vadd.f32 %v172_v60, %v171_v59 }
  0xa1   :  { %v174_v62 = vrot.slane %v173_v61, 2 }
  0xa3   :  { %v175_v63 = vadd.f32 %v174_v62, %v173_v61 }
  0xa5   :  { %v176_v0 = vrot.slane %v175_v63, 1 }
  0xa7   :  { %v177_v1 = vadd.f32 %v176_v0, %v175_v63 }
  0xa9   :  { %200 = vpush %v177_v1 }
  0xda   :  { %s201_s24 = spop %200 }
  0xdb   :  { %v179_v2 = vstv %s201_s24 }
  0xdc   :  { %181 = vst.msk [vmem:[#allocation8] sm:$0x1] %vm180_vm0, %v179_v2 }
  0xdd   :  { %192 = dma.vmem_to_hbm [thread:$0]  %s188_s1, 16, %s190_s23, [#allocation5]  }
  0xde   :  { %283 = dma.done.wait [#allocation5], 16  }
  0xdf   :  { %284 = vsyncadd [#allocation5], 4294967280 }
  0xe0   :  { %197 = vsyncpa [#allocation4], 1 }
  0xe1   :  { %198 = vsyncpa [#allocation7], 1 }
  0xe2   :  { %199 = vsyncpa [#allocation5], 1 }

</bundles_post_ra>
